<compile_context>
chip_gen: v7x
topology: tpu7x:2x2x1
jax: 0.10.0
libtpu: 0.0.40
codegen_flags: <defaults>
</compile_context>

<pallas_src>
import functools

import jax
import jax.numpy as jnp
from jax.experimental import pallas as pl
from jax.experimental.pallas import tpu as pltpu


def _round_up(n, m):
    return ((n + m - 1) // m) * m


# ---------------------------------------------------------------------------
# Device-aware tiling helpers
# ---------------------------------------------------------------------------
def _device_kind():
    try:
        return jax.devices()[0].device_kind.lower()
    except Exception:
        return ""


def _vmem_capacity(kind):
    try:
        return int(pltpu.get_tpu_info().vmem_capacity_bytes)
    except Exception:
        pass
    # Fallback guesses: v5e / v6e have 128 MiB VMEM, be conservative otherwise
    if "v5" in kind or "v6" in kind:
        return 128 * 2**20
    return 64 * 2**20


def _pick_tiles(H, H4, A, E, kind, vmem_cap, tm=None, tk4=None):
    """Choose (token tile, ffn chunk).  Defaults are device-aware."""
    if tm is None:
        tm = 512 if ("v6" in kind or "v7" in kind) else 256
        # Clamp to the expected per-expert group size so tile-aligned group
        # padding stays small for short sequences / decode.  With >=2
        # non-empty expert groups the token-tile axis also spans both v7x TCs.
        tm = min(tm, _round_up(max(A // E, 1), 16))
    tm = max(16, min(_round_up(tm, 16), _round_up(max(A, 1), 16)))

    if tk4 is None or tk4 >= H4:
        tk4 = H4                      # unchunked by default
        budget = 0.4 * vmem_cap       # double-buffered W1+W2 chunk budget
        while 8 * H * tk4 > budget and tk4 > 256:   # 8*H*tk4 = 2 bufs * (W1+W2) bf16
            tk4 = max(256, _round_up((tk4 + 1) // 2, 128))
    else:
        tk4 = max(128, _round_up(tk4, 128))
    return tm, tk4


def _vmem_limit(tm, tk4, H, vmem_cap):
    est = (8 * H * tk4              # W1+W2 chunk, bf16, double-buffered
           + 2 * tm * H * 2         # x tile bf16, double-buffered
           + 2 * tm * H * 4         # f32 out tile, double-buffered
           + 2 * tm * 128 * 4       # combine-weight tile (lane padded)
           + 2 * 8 * (tk4 + H) * 4  # b1/b2 chunks (sublane padded)
           + 2 * tm * tk4 * 4)      # f32 `h` temporary headroom
    return int(min(0.9 * vmem_cap, max(32 * 2**20, int(1.25 * est))))


# ---------------------------------------------------------------------------
# Pallas kernel: grouped expert FFN
# ---------------------------------------------------------------------------
def moe_grouped_kernel(gid_ref, valid_ref, x_ref, w1_ref, b1_ref, w2_ref,
                       b2_ref, wgt_ref, o_ref, *, bf16_silu):
    """Grid = (token_tiles, ffn_chunks).

    gid_ref   : SMEM (num_tiles,) int32 -- expert id owning each token tile.
    valid_ref : SMEM (num_tiles,) int32 -- 1 if the tile holds real tokens.
    x_ref     : (tm, H)   bf16 tokens of this tile (sorted/compacted by expert).
    w1_ref    : (H, tk4)  bf16 chunk of expert gid's up-projection.
    w2_ref    : (tk4, H)  bf16 chunk of expert gid's down-projection.
    wgt_ref   : (tm, 1)   f32 per-row top-k combine weight (0 for padding rows).
    o_ref     : (tm, H)   f32, resident across the chunk axis (in-place acc).
    """
    m = pl.program_id(0)
    k = pl.program_id(1)

    @pl.when(k == 0)
    def _init():
        o_ref[...] = jnp.zeros_like(o_ref)

    @pl.when(valid_ref[m] > 0)
    def _compute():
        h = jnp.dot(x_ref[...], w1_ref[...],
                    preferred_element_type=jnp.float32)
        h = h + b1_ref[...]
        if bf16_silu:                       # v6e/v7x: bf16 VPU + EUP
            hb = h.astype(jnp.bfloat16)
            hs = hb * jax.lax.logistic(hb)
        else:                               # v5e: keep SiLU in f32
            hs = (h * jax.lax.logistic(h)).astype(jnp.bfloat16)
        y = jnp.dot(hs, w2_ref[...], preferred_element_type=jnp.float32)
        b2_scale = jnp.where(k == 0, 1.0, 0.0)      # add b2 once per tile
        o_ref[...] += wgt_ref[...] * (y + b2_scale * b2_ref[...])


def moe_grouped_matmul(tile_gid, tile_valid, x_sorted, wgt, w1, b1, w2, b2,
                       *, tm, tk4, bf16_silu, vmem_limit):
    A_cap, H = x_sorted.shape
    H4_pad = w1.shape[2]
    num_m = A_cap // tm
    n_k = H4_pad // tk4

    kernel = functools.partial(moe_grouped_kernel, bf16_silu=bf16_silu)

    return pl.pallas_call(
        kernel,
        out_shape=jax.ShapeDtypeStruct((A_cap, H), jnp.float32),
        grid_spec=pltpu.PrefetchScalarGridSpec(
            num_scalar_prefetch=2,
            grid=(num_m, n_k),
            in_specs=[
                # tokens of this tile (resident across the chunk axis)
                pl.BlockSpec((tm, H), lambda m, k, gid, val: (m, 0)),
                # expert weights: data-dependent index via scalar prefetch.
                # Consecutive tiles of the same expert keep the same block
                # index, so the weight DMA is issued once per expert.
                pl.BlockSpec((None, H, tk4),
                             lambda m, k, gid, val: (gid[m], 0, k)),
                pl.BlockSpec((None, 1, tk4),
                             lambda m, k, gid, val: (gid[m], 0, k)),
                pl.BlockSpec((None, tk4, H),
                             lambda m, k, gid, val: (gid[m], k, 0)),
                pl.BlockSpec((None, 1, H),
                             lambda m, k, gid, val: (gid[m], 0, 0)),
                # per-row combine weight
                pl.BlockSpec((tm, 1), lambda m, k, gid, val: (m, 0)),
            ],
            out_specs=pl.BlockSpec((tm, H), lambda m, k, gid, val: (m, 0)),
        ),
        compiler_params=pltpu.CompilerParams(
            dimension_semantics=("parallel", "arbitrary"),
            vmem_limit_bytes=vmem_limit),
    )(tile_gid, tile_valid, x_sorted, w1, b1, w2, b2, wgt)


# ---------------------------------------------------------------------------
# Forward pass (routing glue in JAX + grouped Pallas GEMM)
# ---------------------------------------------------------------------------
@functools.partial(jax.jit,
                   static_argnames=("top_k", "tm", "tk4", "bf16_silu",
                                    "vmem_limit"))
def _moe_forward_impl(x_bsh, params, *, top_k, tm, tk4, bf16_silu, vmem_limit):
    B, S, H = x_bsh.shape
    E, _, H4 = params["w1"].shape
    T = B * S
    A = T * top_k

    x = x_bsh.reshape(T, H).astype(jnp.float32)

    # ---- router: tiny, plain XLA (matches the reference math exactly) ----
    logits = x @ params["wg"] + params["bg"]                   # (T, E) f32
    top_vals, top_idx = jax.lax.top_k(logits, top_k)
    top_w = jax.nn.softmax(top_vals, axis=-1)                  # (T, k)

    expert_flat = top_idx.reshape(A).astype(jnp.int32)
    weight_flat = top_w.reshape(A).astype(jnp.float32)
    token_flat = jnp.repeat(jnp.arange(T, dtype=jnp.int32), top_k)

    # ---- sort assignments by expert and compact into tile-aligned groups ----
    order = jnp.argsort(expert_flat)
    sorted_expert = expert_flat[order]
    sorted_token = token_flat[order]
    sorted_weight = weight_flat[order]

    counts = jnp.zeros((E,), jnp.int32).at[expert_flat].add(1)
    counts_pad = ((counts + tm - 1) // tm) * tm                # tile-aligned
    group_start = jnp.concatenate(
        [jnp.zeros((1,), jnp.int32), jnp.cumsum(counts)])[:E]
    group_start_aligned = jnp.concatenate(
        [jnp.zeros((1,), jnp.int32), jnp.cumsum(counts_pad)])[:E]

    pos_in_group = jnp.arange(A, dtype=jnp.int32) - group_start[sorted_expert]
    dest = group_start_aligned[sorted_expert] + pos_in_group   # unique rows

    A_cap = _round_up(A, tm) + E * tm          # static capacity (worst case)
    num_m = A_cap // tm

    buf_token = jnp.zeros((A_cap,), jnp.int32).at[dest].set(sorted_token)
    buf_weight = jnp.zeros((A_cap,), jnp.float32).at[dest].set(sorted_weight)

    x_sorted = x.astype(jnp.bfloat16)[buf_token]               # (A_cap, H)

    # per-tile expert id + validity (scalar prefetch tables)
    ends_aligned = jnp.cumsum(counts_pad)                      # (E,)
    total_used = ends_aligned[E - 1]
    tile_start = jnp.arange(num_m, dtype=jnp.int32) * tm
    tile_gid = jnp.minimum(
        jnp.searchsorted(ends_aligned, tile_start, side="right"),
        E - 1).astype(jnp.int32)
    tile_valid = (tile_start < total_used).astype(jnp.int32)

    # ---- expert weights (bf16 for the MXU); pad 4H up to a multiple of tk4 ----
    w1 = params["w1"].astype(jnp.bfloat16)
    w2 = params["w2"].astype(jnp.bfloat16)
    b1 = params["b1"].astype(jnp.float32)
    b2 = params["b2"].astype(jnp.float32)
    H4_pad = _round_up(H4, tk4)
    if H4_pad != H4:
        w1 = jnp.pad(w1, ((0, 0), (0, 0), (0, H4_pad - H4)))
        b1 = jnp.pad(b1, ((0, 0), (0, H4_pad - H4)))
        w2 = jnp.pad(w2, ((0, 0), (0, H4_pad - H4), (0, 0)))

    # ---- grouped expert FFN (Pallas) ----
    y_sorted = moe_grouped_matmul(
        tile_gid, tile_valid, x_sorted, buf_weight.reshape(A_cap, 1),
        w1, b1.reshape(E, 1, H4_pad), w2, b2.reshape(E, 1, H),
        tm=tm, tk4=tk4, bf16_silu=bf16_silu, vmem_limit=vmem_limit)

    # ---- scatter-add weighted expert outputs back to token order ----
    out = jnp.zeros((T, H), jnp.float32).at[buf_token].add(y_sorted)
    return out.reshape(B, S, H).astype(x_bsh.dtype)


def moe_layer_forward(x_bsh, params, *, top_k=2, tm=None, tk4=None):
    """Pallas implementation of MoELayer.forward for x of shape (B, S, H)."""
    B, S, H = x_bsh.shape
    E, _, H4 = params["w1"].shape
    A = B * S * top_k

    kind = _device_kind()
    vmem_cap = _vmem_capacity(kind)
    tm_eff, tk4_eff = _pick_tiles(H, H4, A, E, kind, vmem_cap, tm=tm, tk4=tk4)
    bf16_silu = ("v6" in kind) or ("v7" in kind)
    vmem_limit = _vmem_limit(tm_eff, tk4_eff, H, vmem_cap)

    return _moe_forward_impl(x_bsh, params, top_k=top_k, tm=tm_eff,
                             tk4=tk4_eff, bf16_silu=bf16_silu,
                             vmem_limit=vmem_limit)


# ---------------------------------------------------------------------------
# Deterministic parameter init (shapes from MoELayer.__init__)
# ---------------------------------------------------------------------------
def init_moe_params(key, hidden, experts):
    ks = jax.random.split(key, 6)
    s = 0.02
    return {
        # gate: Linear(H -> E), stored pre-transposed as (H, E)
        "wg": (jax.random.normal(ks[0], (hidden, experts)) * s).astype(jnp.float32),
        "bg": (jax.random.normal(ks[1], (experts,)) * s).astype(jnp.float32),
        # expert up-proj: Linear(H -> 4H), stored (E, H, 4H)
        "w1": (jax.random.normal(ks[2], (experts, hidden, 4 * hidden)) * s).astype(jnp.float32),
        "b1": (jax.random.normal(ks[3], (experts, 4 * hidden)) * s).astype(jnp.float32),
        # expert down-proj: Linear(4H -> H), stored (E, 4H, H)
        "w2": (jax.random.normal(ks[4], (experts, 4 * hidden, hidden)) * s).astype(jnp.float32),
        "b2": (jax.random.normal(ks[5], (experts, hidden)) * s).astype(jnp.float32),
    }


def moe_layer_reference(x_bsh, params, top_k=2):
    """Pure-JAX f32 reference mirroring the PyTorch MoELayer.forward math."""
    B, S, H = x_bsh.shape
    E = params["wg"].shape[1]
    x = x_bsh.reshape(B * S, H)
    logits = x @ params["wg"] + params["bg"]
    top_vals, top_idx = jax.lax.top_k(logits, top_k)
    top_w = jax.nn.softmax(top_vals, axis=-1)

    def expert(j, xx):
        h = xx @ params["w1"][j] + params["b1"][j]
        h = h * jax.nn.sigmoid(h)
        return h @ params["w2"][j] + params["b2"][j]

    expert_outs = jnp.stack([expert(j, x) for j in range(E)], axis=0)  # (E,T,H)
    out = jnp.zeros_like(x)
    for i in range(top_k):
        mask = jax.nn.one_hot(top_idx[:, i], E, dtype=jnp.float32)      # (T,E)
        eo = jnp.einsum("te,eth->th", mask, expert_outs)
        out = out + eo * top_w[:, i][:, None]
    return out.reshape(B, S, H)


if __name__ == "__main__":
    HIDDEN = 128      # small stand-in for base_model.config.hidden_size
    EXPERTS = 10
    TOP_K = 2
    B, S = 2, 13      # T = 26 tokens, A = 52 expert assignments

    key = jax.random.PRNGKey(0)
    k_x, k_p = jax.random.split(key)
    params = init_moe_params(k_p, HIDDEN, EXPERTS)
    x = jax.random.normal(k_x, (B, S, HIDDEN), dtype=jnp.float32)

    ref = moe_layer_reference(x, params, top_k=TOP_K)

    # default device-aware tiling (unchunked FFN)
    out1 = jax.block_until_ready(moe_layer_forward(x, params, top_k=TOP_K))
    # forced small token tile + chunked (and zero-padded) 4H reduction path
    out2 = jax.block_until_ready(
        moe_layer_forward(x, params, top_k=TOP_K, tm=16, tk4=384))

    assert out1.shape == (B, S, HIDDEN)
    assert out2.shape == (B, S, HIDDEN)
    # bf16 matmul operands vs. f32 reference -> loosened tolerance
    assert jnp.allclose(out1, ref, atol=1e-2, rtol=1e-2), "mismatch (default tiling)"
    assert jnp.allclose(out2, ref, atol=1e-2, rtol=1e-2), "mismatch (chunked tiling)"

    print("KERNEL_OK")
</pallas_src>

<mosaic_0001>
module attributes {stable_mosaic.version = 11 : i64} {
  func.func @moe_grouped_kernel(%arg0: i32, %arg1: i32, %arg2: memref<14xi32, #tpu.memory_space<smem>>, %arg3: memref<14xi32, #tpu.memory_space<smem>>, %arg4: memref<16x128xbf16, #tpu.memory_space<vmem>>, %arg5: memref<1x128x512xbf16, #tpu.memory_space<vmem>>, %arg6: memref<1x1x512xf32, #tpu.memory_space<vmem>>, %arg7: memref<1x512x128xbf16, #tpu.memory_space<vmem>>, %arg8: memref<1x1x128xf32, #tpu.memory_space<vmem>>, %arg9: memref<16x1xf32, #tpu.memory_space<vmem>>, %arg10: memref<16x128xf32, #tpu.memory_space<vmem>>) attributes {dimension_semantics = [#tpu.dimension_semantics<parallel>, #tpu.dimension_semantics<arbitrary>], iteration_bounds = array<i64: 14, 1>, scalar_prefetch = 2 : i64, scratch_operands = 0 : i64, tpu.core_type = #tpu.core_type<tc>, window_params = [{transform_indices = @transform_0, window_bounds = array<i64: 16, 128>}, {transform_indices = @transform_1, window_bounds = array<i64: 1, 128, 512>}, {transform_indices = @transform_2, window_bounds = array<i64: 1, 1, 512>}, {transform_indices = @transform_3, window_bounds = array<i64: 1, 512, 128>}, {transform_indices = @transform_4, window_bounds = array<i64: 1, 1, 128>}, {transform_indices = @transform_5, window_bounds = array<i64: 16, 1>}, {transform_indices = @transform_6, window_bounds = array<i64: 16, 128>}]} {
    %c0_i32 = arith.constant 0 : i32
    %0 = arith.cmpi eq, %arg1, %c0_i32 : i32
    %1 = arith.extui %0 : i1 to i32
    %c0_i32_0 = arith.constant 0 : i32
    %2 = arith.cmpi ne, %1, %c0_i32_0 : i32
    scf.if %2 {
      %cst = arith.constant 0.000000e+00 : f32
      %8 = vector.broadcast %cst : f32 to vector<16x128xf32>
      %c0 = arith.constant 0 : index
      %c0_3 = arith.constant 0 : index
      %9 = vector.load %arg10[%c0, %c0_3] : memref<16x128xf32, #tpu.memory_space<vmem>>, vector<16x128xf32>
      tpu.vector_store %arg10[%c0, %c0_3], %8 {strides = array<i32>} : memref<16x128xf32, #tpu.memory_space<vmem>>, vector<16x128xf32>,
    } else {
    }
    %3 = arith.index_cast %arg0 : i32 to index
    %4 = memref.load %arg3[%3] : memref<14xi32, #tpu.memory_space<smem>>
    %c0_i32_1 = arith.constant 0 : i32
    %5 = arith.cmpi sgt, %4, %c0_i32_1 : i32
    %6 = arith.extui %5 : i1 to i32
    %c0_i32_2 = arith.constant 0 : i32
    %7 = arith.cmpi ne, %6, %c0_i32_2 : i32
    scf.if %7 {
      %c0 = arith.constant 0 : index
      %c0_3 = arith.constant 0 : index
      %8 = vector.load %arg4[%c0, %c0_3] : memref<16x128xbf16, #tpu.memory_space<vmem>>, vector<16x128xbf16>
      %c0_4 = arith.constant 0 : index
      %c0_5 = arith.constant 0 : index
      %c0_6 = arith.constant 0 : index
      %9 = vector.load %arg5[%c0_4, %c0_5, %c0_6] : memref<1x128x512xbf16, #tpu.memory_space<vmem>>, vector<1x128x512xbf16>
      %10 = vector.shape_cast %9 : vector<1x128x512xbf16> to vector<128x512xbf16>
      %cst = arith.constant dense<0.000000e+00> : vector<16x512xf32>
      %11 = tpu.matmul %8, %10, %cst {dimension_numbers = #tpu.dot_dimension_numbers<[1], [0], [0], [1], [0, 0, 1, 1], [], []>} : vector<16x128xbf16>, vector<128x512xbf16>, vector<16x512xf32> -> vector<16x512xf32>
      %c0_7 = arith.constant 0 : index
      %c0_8 = arith.constant 0 : index
      %c0_9 = arith.constant 0 : index
      %12 = vector.load %arg6[%c0_7, %c0_8, %c0_9] : memref<1x1x512xf32, #tpu.memory_space<vmem>>, vector<1x1x512xf32>
      %13 = vector.shape_cast %12 : vector<1x1x512xf32> to vector<1x512xf32>
      %14 = vector.broadcast %13 : vector<1x512xf32> to vector<16x512xf32>
      %15 = arith.addf %11, %14 : vector<16x512xf32>
      %16 = arith.negf %15 : vector<16x512xf32>
      %17 = math.exp %16 : vector<16x512xf32>
      %cst_10 = arith.constant 1.000000e+00 : f32
      %18 = vector.broadcast %cst_10 : f32 to vector<16x512xf32>
      %19 = arith.addf %18, %17 : vector<16x512xf32>
      %20 = arith.divf %18, %19 : vector<16x512xf32>
      %21 = arith.mulf %15, %20 : vector<16x512xf32>
      %22 = arith.truncf %21 : vector<16x512xf32> to vector<16x512xbf16>
      %c0_11 = arith.constant 0 : index
      %c0_12 = arith.constant 0 : index
      %c0_13 = arith.constant 0 : index
      %23 = vector.load %arg7[%c0_11, %c0_12, %c0_13] : memref<1x512x128xbf16, #tpu.memory_space<vmem>>, vector<1x512x128xbf16>
      %24 = vector.shape_cast %23 : vector<1x512x128xbf16> to vector<512x128xbf16>
      %cst_14 = arith.constant dense<0.000000e+00> : vector<16x128xf32>
      %25 = tpu.matmul %22, %24, %cst_14 {dimension_numbers = #tpu.dot_dimension_numbers<[1], [0], [0], [1], [0, 0, 1, 1], [], []>} : vector<16x512xbf16>, vector<512x128xbf16>, vector<16x128xf32> -> vector<16x128xf32>
      %c0_i32_15 = arith.constant 0 : i32
      %26 = arith.cmpi eq, %arg1, %c0_i32_15 : i32
      %cst_16 = arith.constant 1.000000e+00 : f32
      %cst_17 = arith.constant 0.000000e+00 : f32
      %27 = arith.select %26, %cst_16, %cst_17 : f32
      %c0_18 = arith.constant 0 : index
      %c0_19 = arith.constant 0 : index
      %28 = vector.load %arg10[%c0_18, %c0_19] : memref<16x128xf32, #tpu.memory_space<vmem>>, vector<16x128xf32>
      %c0_20 = arith.constant 0 : index
      %c0_21 = arith.constant 0 : index
      %29 = vector.load %arg9[%c0_20, %c0_21] : memref<16x1xf32, #tpu.memory_space<vmem>>, vector<16x1xf32>
      %c0_22 = arith.constant 0 : index
      %c0_23 = arith.constant 0 : index
      %c0_24 = arith.constant 0 : index
      %30 = vector.load %arg8[%c0_22, %c0_23, %c0_24] : memref<1x1x128xf32, #tpu.memory_space<vmem>>, vector<1x1x128xf32>
      %31 = vector.shape_cast %30 : vector<1x1x128xf32> to vector<1x128xf32>
      %32 = vector.broadcast %27 : f32 to vector<1x128xf32>
      %33 = arith.mulf %32, %31 : vector<1x128xf32>
      %34 = vector.broadcast %33 : vector<1x128xf32> to vector<16x128xf32>
      %35 = arith.addf %25, %34 : vector<16x128xf32>
      %36 = vector.broadcast %29 : vector<16x1xf32> to vector<16x128xf32>
      %37 = arith.mulf %36, %35 : vector<16x128xf32>
      %38 = arith.addf %28, %37 : vector<16x128xf32>
      %c0_25 = arith.constant 0 : index
      %c0_26 = arith.constant 0 : index
      %39 = vector.load %arg10[%c0_25, %c0_26] : memref<16x128xf32, #tpu.memory_space<vmem>>, vector<16x128xf32>
      tpu.vector_store %arg10[%c0_25, %c0_26], %38 {strides = array<i32>} : memref<16x128xf32, #tpu.memory_space<vmem>>, vector<16x128xf32>,
    } else {
    }
    return
  }
  func.func @transform_0(%arg0: i32, %arg1: i32, %arg2: memref<14xi32, #tpu.memory_space<smem>>, %arg3: memref<14xi32, #tpu.memory_space<smem>>) -> (i32, i32) {
    %c0_i32 = arith.constant 0 : i32
    %c0_i32_0 = arith.constant 0 : i32
    return %arg0, %c0_i32 : i32, i32
  }
  func.func @transform_1(%arg0: i32, %arg1: i32, %arg2: memref<14xi32, #tpu.memory_space<smem>>, %arg3: memref<14xi32, #tpu.memory_space<smem>>) -> (i32, i32, i32) {
    %0 = arith.index_cast %arg0 : i32 to index
    %1 = memref.load %arg2[%0] : memref<14xi32, #tpu.memory_space<smem>>
    %c0_i32 = arith.constant 0 : i32
    %c0_i32_0 = arith.constant 0 : i32
    return %1, %c0_i32, %arg1 : i32, i32, i32
  }
  func.func @transform_2(%arg0: i32, %arg1: i32, %arg2: memref<14xi32, #tpu.memory_space<smem>>, %arg3: memref<14xi32, #tpu.memory_space<smem>>) -> (i32, i32, i32) {
    %0 = arith.index_cast %arg0 : i32 to index
    %1 = memref.load %arg2[%0] : memref<14xi32, #tpu.memory_space<smem>>
    %c0_i32 = arith.constant 0 : i32
    %c0_i32_0 = arith.constant 0 : i32
    return %1, %c0_i32, %arg1 : i32, i32, i32
  }
  func.func @transform_3(%arg0: i32, %arg1: i32, %arg2: memref<14xi32, #tpu.memory_space<smem>>, %arg3: memref<14xi32, #tpu.memory_space<smem>>) -> (i32, i32, i32) {
    %0 = arith.index_cast %arg0 : i32 to index
    %1 = memref.load %arg2[%0] : memref<14xi32, #tpu.memory_space<smem>>
    %c0_i32 = arith.constant 0 : i32
    %c0_i32_0 = arith.constant 0 : i32
    return %1, %arg1, %c0_i32 : i32, i32, i32
  }
  func.func @transform_4(%arg0: i32, %arg1: i32, %arg2: memref<14xi32, #tpu.memory_space<smem>>, %arg3: memref<14xi32, #tpu.memory_space<smem>>) -> (i32, i32, i32) {
    %0 = arith.index_cast %arg0 : i32 to index
    %1 = memref.load %arg2[%0] : memref<14xi32, #tpu.memory_space<smem>>
    %c0_i32 = arith.constant 0 : i32
    %c0_i32_0 = arith.constant 0 : i32
    %c0_i32_1 = arith.constant 0 : i32
    return %1, %c0_i32, %c0_i32_0 : i32, i32, i32
  }
  func.func @transform_5(%arg0: i32, %arg1: i32, %arg2: memref<14xi32, #tpu.memory_space<smem>>, %arg3: memref<14xi32, #tpu.memory_space<smem>>) -> (i32, i32) {
    %c0_i32 = arith.constant 0 : i32
    %c0_i32_0 = arith.constant 0 : i32
    return %arg0, %c0_i32 : i32, i32
  }
  func.func @transform_6(%arg0: i32, %arg1: i32, %arg2: memref<14xi32, #tpu.memory_space<smem>>, %arg3: memref<14xi32, #tpu.memory_space<smem>>) -> (i32, i32) {
    %c0_i32 = arith.constant 0 : i32
    %c0_i32_0 = arith.constant 0 : i32
    return %arg0, %c0_i32 : i32, i32
  }
}

</mosaic_0001>

<bundles_post_ra>
// kernel: custom-call.1
= control target key start
LH: loop header
LB: loop body
LE: loop exit
PB: predicated region body
PF: predicated region fallthrough
CT: control target
= control target key end

     0   :  { %s6_s0 = inlined_call_operand.vmem [shape: u32[14], index: 0, kind: output, shape index: {}]  }

// kernel: _moe_forward_impl.1
= control target key start
LH: loop header
LB: loop body
LE: loop exit
PB: predicated region body
PF: predicated region fallthrough
CT: control target
= control target key end

     0   :  { %s1865_s0 = inlined_call_operand.vmem [shape: s32[14], index: 0, kind: input, shape index: {}]   ;;  %s1866_s2 = inlined_call_operand.vmem [shape: bf16[224,128], index: 2, kind: input, shape index: {}]   ;;  %s1867_s3 = inlined_call_operand.vmem [shape: bf16[10,128,512], index: 3, kind: input, shape index: {}]   ;;  %s1868_s4 = inlined_call_operand.vmem [shape: f32[10,1,512], index: 4, kind: input, shape index: {}]   ;;  %s1869_s5 = inlined_call_operand.vmem [shape: bf16[10,512,128], index: 5, kind: input, shape index: {}]   ;;  %s1870_s6 = inlined_call_operand.vmem [shape: f32[10,1,128], index: 6, kind: input, shape index: {}]   ;;  %s1871_s7 = inlined_call_operand.vmem [shape: f32[224,1], index: 7, kind: input, shape index: {}]   ;;  %s1872_s8 = inlined_call_operand.vmem [shape: f32[224,128], index: 8, kind: output, shape index: {}]   ;;  %s1873_s1 = inlined_call_operand.vmem [shape: s32[14], index: 1, kind: input, shape index: {}]  }
   0x1   :  { %s13_s29 = sshll.u32 %s1865_s0, 4  ;;  %s17_s10 = sshll.u32 %s1873_s1, 4  ;;  %s14_s29 = int_to_ptr.vmem [resolvable:$true] %s13_s29  ;;  %s18_s10 = int_to_ptr.vmem [resolvable:$true] %s17_s10 }
   0x2   :  { %s1614_s11 = scalar_lea.vmem %s14_s29, 16  ;;  %p1619_p1 = scmp.lt.s32.totalorder %s14_s29, %s14_s29 }
   0x3   :  { %p1615_p0 = scmp.ne.s32.totalorder %s14_s29, %s1614_s11  ;;  %p1620_p2 = scmp.lt.s32.totalorder %s1614_s11, %s1614_s11 }
   0x5   :  { %p1621_p3 = por %p1620_p2, %p1619_p1 }
   0x7   :  { %p1622_p4 = pnand %p1621_p3, %p1615_p0 }
   0x9   :  { %1625 = shalt.err (!%p1622_p4)  }
   0xa   :  { %s1664_s12 = smov [#allocation3]   ;;  %s1626_s13 = scalar_lea.vmem %s18_s10, 16 }
   0xb   :  { %16 = dma.vmem_to_smem %s14_s29, 16, %s1664_s12, [#allocation2] }
   0xc   :  { %p1627_p5 = scmp.ne.s32.totalorder %s18_s10, %s1626_s13  ;;  %p1631_p6 = scmp.lt.s32.totalorder %s18_s10, %s18_s10 }
   0xd   :  { %p1632_p7 = scmp.lt.s32.totalorder %s1626_s13, %s1626_s13 }
   0xf   :  { %p1633_p8 = por %p1632_p7, %p1631_p6 }
  0x11   :  { %p1634_p9 = pnand %p1633_p8, %p1627_p5 }
  0x13   :  { %1637 = shalt.err (!%p1634_p9)  }
  0x14   :  { %s1665_s0 = smov [#allocation4]  }
  0x15   :  { %20 = dma.vmem_to_smem %s18_s10, 16, %s1665_s0, [#allocation2] }
  0x16   :  { %1650 = dma.done.wait [#allocation2], 32 }
  0x17   :  { %1651 = vsyncadd [#allocation2], 4294967264 }
  0x18   :  { %22 = sfence }
  0x19   :  { %s1719_s1 = smov 0   ;;  %s1721_s14 = smov 0  }
  0x1a   :  { %s1723_s15 = smov 0  }
  0x1b LB: > { %s40_s16 = sadd.s32 1, %s1658_s14  ;;  %p1337_p10 = scmp.ge.s32.totalorder %s1662_s15, 1  ;;  %s1662_s15 = sphi %s1723_s15, %s28_s15   ;;  %s1658_s14 = sphi %s1721_s14, %s1875_s14   ;;  %s1654_s1 = sphi %s1719_s1, %s1874_s1  }
  0x1c   : > { %p42_p11 = scmp.ge.s32.totalorder %s40_s16, 14  ;;  %p322_p12 = scmp.lt.s32.totalorder %s1662_s15, 15 }
  0x1e   : > { %s1877_s16 = smov (%p42_p11, %s40_s16), 0  ;;  %p323_p13 = pnand %p1337_p10, %p322_p12 }
  0x1f   : > { %s1338_s17 = sshll.u32 (!%p323_p13), %s1654_s1, 1  ;;  %s396_s18 = sld [smem:[#allocation3 + %s1654_s1]] (!%p323_p13)  ;;  %v1666_v0 = vmov (!%p323_p13), 0.0  }
  0x20   : > { %326 = sbr.rel (%p323_p13) target bundleno = 561 (0x231), region = 44  ;;  %p391_p0 = scmp.lt.s32.totalorder (!%p323_p13), %s1338_s17, 27 }
  0x21   : > { %s408_s19 = sld [smem:[#allocation3 + %s1654_s1]] (!%p323_p13) }
  0x22   : > { %s419_s20 = sld [smem:[#allocation3 + %s1654_s1]] (!%p323_p13) }
  0x23   : > { %s431_s21 = sld [smem:[#allocation3 + %s1654_s1]] (!%p323_p13) }
  0x24   : > { %s455_s22 = sld [smem:[#allocation4 + %s1654_s1]] (!%p323_p13) }
  0x25   : > { %p398_p1 = scmp.lt.s32.totalorder (!%p323_p13), %s396_s18, 9 }
  0x27   : > { %s1879_s17 = smov (!%p391_p0, %s1338_s17), 27  ;;  %p410_p2 = scmp.lt.s32.totalorder %s408_s19, 9 }
  0x28   : > { %s1339_s23 = sshll.u32 %s1879_s17, 2  ;;  %s1346_s24 = sshll.u32 %s1879_s17, 3 }
  0x29   : > { %s1740_s27 = scalar_lea.vmem %s1866_s2, %s1339_s23  ;;  %s1745_s30 = scalar_lea.vmem %s1871_s7, %s1346_s24 }
  0x2a   : > { %s1881_s18 = smov (!%p398_p1, %s396_s18), 9  ;;  %s1883_s19 = smov (!%p410_p2, %s408_s19), 9 }
  0x2b   : > { %s1426_s9 = sshll.u32 %s1881_s18, 8  ;;  %p421_p3 = scmp.lt.s32.totalorder %s419_s20, 9 }
  0x2c   : > { %s1750_s12 = scalar_lea.vmem %s1867_s3, %s1426_s9  ;;  %s1342_s13 = sshll.u32 %s1883_s19, 2 }
  0x2d   : > { %s1755_s17 = scalar_lea.vmem %s1868_s4, %s1342_s13  ;;  %p432_p4 = scmp.lt.s32.totalorder %s431_s21, 9 }
  0x2e   : > { %s1885_s20 = smov (!%p421_p3, %s419_s20), 9  ;;  %s1762_s26 = scalar_lea.vmem %s1872_s8, %s1346_s24 }
  0x2f   : > { %s1887_s21 = smov (!%p432_p4, %s431_s21), 9  ;;  %s1427_s23 = sshll.u32 %s1885_s20, 8  ;;  %453 = vst [vmem:[%s1762_s26] sm:$0xff] %v1666_v0  ;;  %454 = vst [vmem:[%s1762_s26 + $0x8] sm:$0xff] %v1666_v0 }
  0x30   : > { %s1767_s19 = scalar_lea.vmem %s1869_s5, %s1427_s23  ;;  %s434_s11 = scalar_lea.vmem %s1870_s6, %s1887_s21 }
  0x31   : > { %p1349_p5 = scmp.le.s32.totalorder %s455_s22, 0 }
  0x32   : > { %v1501_v1 = vld [vmem:[%s1750_s12 + $0x4] ss:$16 sps:$4 sm:$0xff] (!%p1349_p5)   ;;  %v1503_v2 = vld [vmem:[%s1750_s12 + $0xc] ss:$16 sps:$4 sm:$0xff] (!%p1349_p5)   ;;  %v1667_v3 = vmov (!%p1349_p5), 0  }
  0x33   : > { %459 = sbr.rel (%p1349_p5) target bundleno = 561 (0x231), region = 52  ;;  %714 = vmatprep.mubr.bf16.mxu0 (!%p1349_p5), %v1667_v3  ;;  %757 = vmatprep.mubr.bf16.mxu1 (!%p1349_p5), %v1667_v3  ;;  %v1505_v4 = vld [vmem:[%s1750_s12] ss:$16 sps:$4 sm:$0xff] (!%p1349_p5)   ;;  %v1506_v5 = vld [vmem:[%s1750_s12 + $0x8] ss:$16 sps:$4 sm:$0xff] (!%p1349_p5)  }
  0x34   : > { %682 = vmatprep.subr.bf16.mxu0 (!%p1349_p5), %v1501_v1  ;;  %1500 = vset.pattern.permute.xlu0 (!%p1349_p5), %v1667_v3  ;;  %v1507_v6 = vld [vmem:[%s1750_s12 + $0x24] ss:$16 sps:$4 sm:$0xff] (!%p1349_p5)   ;;  %v1509_v7 = vld [vmem:[%s1750_s12 + $0x2c] ss:$16 sps:$4 sm:$0xff] (!%p1349_p5)   ;;  %v1511_v8 = vld [vmem:[%s1750_s12 + $0x20] ss:$16 sps:$4 sm:$0xff] (!%p1349_p5)  }
  0x35   : > { %725 = vmatprep.subr.bf16.mxu1 (!%p1349_p5), %v1503_v2  ;;  %683 = vmatpush1.bf16.msra.mxu0 (!%p1349_p5), %v1505_v4  ;;  %v1512_v9 = vld [vmem:[%s1750_s12 + $0x28] ss:$16 sps:$4 sm:$0xff] (!%p1349_p5)   ;;  %v1513_v10 = vld [vmem:[%s1750_s12 + $0x44] ss:$16 sps:$4 sm:$0xff] (!%p1349_p5)   ;;  %v1515_v11 = vld [vmem:[%s1750_s12 + $0x4c] ss:$16 sps:$4 sm:$0xff] (!%p1349_p5)  }
  0x36   : > { %726 = vmatpush1.bf16.msra.mxu1 (!%p1349_p5), %v1506_v5  ;;  %684 = vmatprep.subr.bf16.mxu0 (!%p1349_p5), %v1507_v6  ;;  %v1517_v12 = vld [vmem:[%s1750_s12 + $0x40] ss:$16 sps:$4 sm:$0xff] (!%p1349_p5)   ;;  %v1518_v13 = vld [vmem:[%s1750_s12 + $0x48] ss:$16 sps:$4 sm:$0xff] (!%p1349_p5)   ;;  %v1519_v14 = vld [vmem:[%s1750_s12 + $0x64] ss:$16 sps:$4 sm:$0xff] (!%p1349_p5)   ;;  %v496_v5 = vlaneseq (!%p1349_p5) }
  0x37   : > { %727 = vmatprep.subr.bf16.mxu1 (!%p1349_p5), %v1509_v7  ;;  %v1521_v15 = vld [vmem:[%s1750_s12 + $0x6c] ss:$16 sps:$4 sm:$0xff] (!%p1349_p5)   ;;  %v1523_v16 = vld [vmem:[%s1750_s12 + $0x60] ss:$16 sps:$4 sm:$0xff] (!%p1349_p5)   ;;  %v1524_v17 = vld [vmem:[%s1750_s12 + $0x68] ss:$16 sps:$4 sm:$0xff] (!%p1349_p5)  }
  0x38   : > { %v1525_v18 = vld [vmem:[%s1750_s12 + $0x84] ss:$16 sps:$4 sm:$0xff] (!%p1349_p5)   ;;  %v1527_v19 = vld [vmem:[%s1750_s12 + $0x8c] ss:$16 sps:$4 sm:$0xff] (!%p1349_p5)   ;;  %v1529_v20 = vld [vmem:[%s1750_s12 + $0x80] ss:$16 sps:$4 sm:$0xff] (!%p1349_p5)  }
  0x39   : > { %685 = vmatpush1.bf16.msra.mxu0 (!%p1349_p5), %v1511_v8  ;;  %v1530_v21 = vld [vmem:[%s1750_s12 + $0x88] ss:$16 sps:$4 sm:$0xff] (!%p1349_p5)   ;;  %v1531_v22 = vld [vmem:[%s1750_s12 + $0xa4] ss:$16 sps:$4 sm:$0xff] (!%p1349_p5)   ;;  %v1533_v23 = vld [vmem:[%s1750_s12 + $0xac] ss:$16 sps:$4 sm:$0xff] (!%p1349_p5)  }
  0x3a   : > { %728 = vmatpush1.bf16.msra.mxu1 %v1512_v9  ;;  %686 = vmatprep.subr.bf16.mxu0 %v1513_v10  ;;  %v1535_v24 = vld [vmem:[%s1750_s12 + $0xa0] ss:$16 sps:$4 sm:$0xff]   ;;  %v1536_v25 = vld [vmem:[%s1750_s12 + $0xa8] ss:$16 sps:$4 sm:$0xff]   ;;  %v1537_v26 = vld [vmem:[%s1750_s12 + $0xc4] ss:$16 sps:$4 sm:$0xff]  }
  0x3b   : > { %729 = vmatprep.subr.bf16.mxu1 %v1515_v11  ;;  %v1539_v27 = vld [vmem:[%s1750_s12 + $0xcc] ss:$16 sps:$4 sm:$0xff]   ;;  %v1541_v28 = vld [vmem:[%s1750_s12 + $0xc0] ss:$16 sps:$4 sm:$0xff]   ;;  %v1542_v29 = vld [vmem:[%s1750_s12 + $0xc8] ss:$16 sps:$4 sm:$0xff]  }
  0x3c   : > { %v1543_v30 = vld [vmem:[%s1750_s12 + $0xe4] ss:$16 sps:$4 sm:$0xff]   ;;  %v1545_v31 = vld [vmem:[%s1750_s12 + $0xec] ss:$16 sps:$4 sm:$0xff]   ;;  %v1547_v32 = vld [vmem:[%s1750_s12 + $0xe0] ss:$16 sps:$4 sm:$0xff]  }
  0x3d   : > { %687 = vmatpush1.bf16.msra.mxu0 %v1517_v12  ;;  %v1548_v33 = vld [vmem:[%s1750_s12 + $0xe8] ss:$16 sps:$4 sm:$0xff]   ;;  %v1549_v34 = vld [vmem:[%s1740_s27] sm:$0xff]   ;;  %v1558_v43 = vld [vmem:[%s1767_s19 + $0x50] sm:$0xff]   ;;  %v497_v6 = vshrl.u32 %v496_v5, 7 }
  0x3e   : > { %730 = vmatpush1.bf16.msra.mxu1 %v1518_v13  ;;  %688 = vmatprep.subr.bf16.mxu0 %v1519_v14  ;;  %v1550_v35 = vld [vmem:[%s1767_s19 + $0x40] sm:$0xff]   ;;  %v1554_v39 = vld [vmem:[%s1767_s19 + $0x48] sm:$0xff]   ;;  %v1559_v44 = vld [vmem:[%s1767_s19 + $0xd0] sm:$0xff]  }
  0x3f   : > { %731 = vmatprep.subr.bf16.mxu1 %v1521_v15  ;;  %v1551_v36 = vld [vmem:[%s1767_s19 + $0xc0] sm:$0xff]   ;;  %v1555_v40 = vld [vmem:[%s1767_s19 + $0xc8] sm:$0xff]   ;;  %v1560_v45 = vld [vmem:[%s1767_s19 + $0x10] sm:$0xff]   ;;  %v498_v7 = vsub.s32 0, %v497_v6  ;;  %v506_v8 = vsub.s32 2, %v497_v6  ;;  %v502_v10 = vsub.s32 1, %v497_v6 }
  0x40   : > { %v1552_v37 = vld [vmem:[%s1767_s19] sm:$0xff]   ;;  %v1556_v41 = vld [vmem:[%s1767_s19 + $0x8] sm:$0xff]   ;;  %v1561_v46 = vld [vmem:[%s1767_s19 + $0x90] sm:$0xff]   ;;  %v510_v11 = vsub.s32 3, %v497_v6 }
  0x41   : > { %689 = vmatpush1.bf16.msra.mxu0 %v1523_v16  ;;  %v1553_v38 = vld [vmem:[%s1767_s19 + $0x80] sm:$0xff]   ;;  %v1557_v42 = vld [vmem:[%s1767_s19 + $0x88] sm:$0xff]   ;;  %v1562_v47 = vld [vmem:[%s1767_s19 + $0x58] sm:$0xff]  }
  0x42   : > { %732 = vmatpush1.bf16.msra.mxu1 %v1524_v17  ;;  %690 = vmatprep.subr.bf16.mxu0 %v1525_v18  ;;  %v1563_v48 = vld [vmem:[%s1767_s19 + $0xd8] sm:$0xff]   ;;  %v1566_v51 = vld [vmem:[%s1767_s19 + $0x60] sm:$0xff]   ;;  %v1570_v55 = vld [vmem:[%s1767_s19 + $0x68] sm:$0xff]  }
  0x43   : > { %733 = vmatprep.subr.bf16.mxu1 %v1527_v19  ;;  %v1564_v49 = vld [vmem:[%s1767_s19 + $0x18] sm:$0xff]   ;;  %v1567_v52 = vld [vmem:[%s1767_s19 + $0xe0] sm:$0xff]   ;;  %v1571_v56 = vld [vmem:[%s1767_s19 + $0xe8] sm:$0xff]  }
  0x44   : > { %v1565_v50 = vld [vmem:[%s1767_s19 + $0x98] sm:$0xff]   ;;  %v1568_v53 = vld [vmem:[%s1767_s19 + $0x20] sm:$0xff]   ;;  %v1572_v57 = vld [vmem:[%s1767_s19 + $0x28] sm:$0xff]  }
  0x45   : > { %691 = vmatpush1.bf16.msra.mxu0 %v1529_v20  ;;  %v1569_v54 = vld [vmem:[%s1767_s19 + $0xa0] sm:$0xff]   ;;  %v1573_v58 = vld [vmem:[%s1767_s19 + $0xa8] sm:$0xff]   ;;  %v1574_v59 = vld [vmem:[%s1767_s19 + $0x70] sm:$0xff]  }
  0x46   : > { %734 = vmatpush1.bf16.msra.mxu1 %v1530_v21  ;;  %692 = vmatprep.subr.bf16.mxu0 %v1531_v22  ;;  %v1575_v60 = vld [vmem:[%s1767_s19 + $0xf0] sm:$0xff]   ;;  %v1578_v63 = vld [vmem:[%s1767_s19 + $0x78] sm:$0xff]   ;;  %v895_v3 = vld [vmem:[%s1745_s30] sm:$0xff] }
  0x47   : > { %735 = vmatprep.subr.bf16.mxu1 %v1533_v23  ;;  %v1576_v61 = vld [vmem:[%s1767_s19 + $0x30] sm:$0xff]   ;;  %v1579_v0 = vld [vmem:[%s1767_s19 + $0xf8] sm:$0xff]   ;;  %1182 = vperm.xlu0 %1500, %v895_v3   ;;  %v896_v4 = vld [vmem:[%s1745_s30 + $0x8] sm:$0xff] }
  0x48   : > { %v1577_v62 = vld [vmem:[%s1767_s19 + $0xb0] sm:$0xff]   ;;  %v1580_v1 = vld [vmem:[%s1767_s19 + $0x38] sm:$0xff]   ;;  %v494_v9 = vld [vmem:[%s1755_s17] sm:$0xf] }
  0x49   : > { %693 = vmatpush1.bf16.msra.mxu0 %v1535_v24  ;;  %v1581_v2 = vld [vmem:[%s1767_s19 + $0xb8] sm:$0xff]   ;;  %v499_v12 = vrot.slane %v494_v9, %v498_v7  ;;  %v507_v13 = vrot.slane %v494_v9, %v506_v8  ;;  %v503_v14 = vrot.slane %v494_v9, %v502_v10  ;;  %v511_v15 = vrot.slane %v494_v9, %v510_v11 }
  0x4a   : > { %736 = vmatpush1.bf16.msra.mxu1 %v1536_v25  ;;  %694 = vmatprep.subr.bf16.mxu0 %v1537_v26 }
  0x4b   : > { %737 = vmatprep.subr.bf16.mxu1 %v1539_v27  ;;  %1187 = vperm.xlu0 %1500, %v896_v4  }
  0x4d   : > { %695 = vmatpush1.bf16.msra.mxu0 %v1541_v28 }
  0x4e   : > { %738 = vmatpush1.bf16.msra.mxu1 %v1542_v29  ;;  %696 = vmatprep.subr.bf16.mxu0 %v1543_v30 }
  0x4f   : > { %739 = vmatprep.subr.bf16.mxu1 %v1545_v31 }
  0x51   : > { %697 = vmatpush1.bf16.msra.mxu0 %v1547_v32 }
  0x52   : > { %740 = vmatpush1.bf16.msra.mxu1 %v1548_v33  ;;  %1428 = vmatprep.subr.bf16.mxu0 %v1550_v35 }
  0x53   : > { %1450 = vmatprep.subr.bf16.mxu1 %v1551_v36 }
  0x54   : > { %715 = vmatmul.mubr.bf16.vlgmr.msra.gmra.mrb[0].mxu0 %v1549_v34 }
  0x55   : > { %758 = vmatmul.mubr.bf16.vlgmr.msra.gmra.mrb[0].mxu1 %v1549_v34  ;;  %1429 = vmatpush3.bf16.msra.mxu0 %v1552_v37 }
  0x56   : > { %1451 = vmatpush3.bf16.msra.mxu1 %v1553_v38  ;;  %1430 = vmatprep.subr.bf16.mxu0 %v1554_v39 }
  0x57   : > { %1452 = vmatprep.subr.bf16.mxu1 %v1555_v40 }
  0x59   : > { %1431 = vmatpush3.bf16.msra.mxu0 %v1556_v41 }
  0x5a   : > { %1453 = vmatpush3.bf16.msra.mxu1 %v1557_v42  ;;  %1432 = vmatprep.subr.bf16.mxu0 %v1558_v43 }
  0x5b   : > { %1454 = vmatprep.subr.bf16.mxu1 %v1559_v44 }
  0x5d   : > { %1433 = vmatpush3.bf16.msra.mxu0 %v1560_v45 }
  0x5e   : > { %1455 = vmatpush3.bf16.msra.mxu1 %v1561_v46  ;;  %1434 = vmatprep.subr.bf16.mxu0 %v1562_v47 }
  0x5f   : > { %1456 = vmatprep.subr.bf16.mxu1 %v1563_v48 }
  0x61   : > { %1435 = vmatpush3.bf16.msra.mxu0 %v1564_v49 }
  0x62   : > { %1457 = vmatpush3.bf16.msra.mxu1 %v1565_v50  ;;  %1436 = vmatprep.subr.bf16.mxu0 %v1566_v51 }
  0x63   : > { %1458 = vmatprep.subr.bf16.mxu1 %v1567_v52 }
  0x65   : > { %1437 = vmatpush3.bf16.msra.mxu0 %v1568_v53 }
  0x66   : > { %1459 = vmatpush3.bf16.msra.mxu1 %v1569_v54  ;;  %1438 = vmatprep.subr.bf16.mxu0 %v1570_v55 }
  0x67   : > { %1460 = vmatprep.subr.bf16.mxu1 %v1571_v56 }
  0x69   : > { %1439 = vmatpush3.bf16.msra.mxu0 %v1572_v57 }
  0x6a   : > { %1461 = vmatpush3.bf16.msra.mxu1 %v1573_v58  ;;  %1440 = vmatprep.subr.bf16.mxu0 %v1574_v59 }
  0x6b   : > { %1462 = vmatprep.subr.bf16.mxu1 %v1575_v60 }
  0x6d   : > { %1441 = vmatpush3.bf16.msra.mxu0 %v1576_v61 }
  0x6e   : > { %1463 = vmatpush3.bf16.msra.mxu1 %v1577_v62  ;;  %1442 = vmatprep.subr.bf16.mxu0 %v1578_v63 }
  0x6f   : > { %1464 = vmatprep.subr.bf16.mxu1 %v1579_v0 }
  0x71   : > { %1443 = vmatpush3.bf16.msra.mxu0 %v1580_v1 }
  0x72   : > { %1465 = vmatpush3.bf16.msra.mxu1 %v1581_v2 }
 0x127   : > { %v716_v16 = vpop.f32.mrb[0].mxu0 }
 0x128   : > { %v759_v17 = vpop.f32.mrb[0].mxu1  ;;  %v717_v18 = vadd.f32 %v716_v16, %v499_v12  ;;  %v718_v20 = vpop.f32.mrb[1].mxu0 }
 0x129   : > { %v760_v19 = vadd.f32 %v759_v17, %v507_v13  ;;  %v761_v21 = vpop.f32.mrb[1].mxu1  ;;  %v719_v22 = vadd.f32 %v718_v20, %v503_v14  ;;  %v720_v24 = vpop.f32.mrb[2].mxu0 }
 0x12a   : > { %v1843_v23 = vadd.f32 %v761_v21, %v511_v15  ;;  %v763_v25 = vpop.f32.mrb[2].mxu1  ;;  %v1383_v26 = vmul.f32 -1.442695, %v717_v18  ;;  %v721_v28 = vadd.f32 %v720_v24, %v499_v12  ;;  %v722_v30 = vpop.f32.mrb[3].mxu0 }
 0x12b   : > { %v1385_v27 = vmul.f32 -1.442695, %v760_v19  ;;  %v764_v29 = vadd.f32 %v763_v25, %v507_v13  ;;  %v765_v31 = vpop.f32.mrb[3].mxu1  ;;  %v1384_v32 = vmul.f32 -1.442695, %v719_v22  ;;  %v723_v34 = vadd.f32 %v722_v30, %v503_v14  ;;  %v1183_v13 = vpop.permute.xlu0 %1182 }
 0x12c   : > { %v1386_v33 = vmul.f32 -1.442695, %v1843_v23  ;;  %v766_v35 = vadd.f32 %v765_v31, %v511_v15  ;;  %1582 = vpow2.f32 %v1383_v26  ;;  %v1387_v36 = vmul.f32 -1.442695, %v721_v28  ;;  %v1391_v15 = vld [vmem:[%s434_s11] ss:$0 sm:$0xff] }
 0x12d   : > { %1584 = vpow2.f32 %v1385_v27  ;;  %v1389_v37 = vmul.f32 -1.442695, %v764_v29  ;;  %v1388_v38 = vmul.f32 -1.442695, %v723_v34 }
 0x12e   : > { %1586 = vpow2.f32 %v1384_v32  ;;  %v1390_v39 = vmul.f32 -1.442695, %v766_v35  ;;  %v894_v32 = vld [vmem:[%s1762_s26 + $0x8] sm:$0xff] }
 0x12f   : > { %1588 = vpow2.f32 %v1386_v33  ;;  %v1188_v33 = vpop.permute.xlu0 %1187 }
 0x130   : > { %1590 = vpow2.f32 %v1387_v36 }
 0x131   : > { %1592 = vpow2.f32 %v1389_v37 }
 0x132   : > { %1594 = vpow2.f32 %v1388_v38 }
 0x133   : > { %1596 = vpow2.f32 %v1390_v39 }
 0x136   : > { %v1583_v40 = vpop.eup %1582 }
 0x137   : > { %v1585_v41 = vpop.eup %1584  ;;  %v792_v42 = vadd.f32 1.0, %v1583_v40 }
 0x138   : > { %v1587_v43 = vpop.eup %1586  ;;  %v794_v44 = vadd.f32 1.0, %v1585_v41 }
 0x139   : > { %v1589_v45 = vpop.eup %1588  ;;  %1598 = vrcp.f32 %v792_v42  ;;  %v793_v46 = vadd.f32 1.0, %v1587_v43 }
 0x13a   : > { %v1591_v47 = vpop.eup %1590  ;;  %1600 = vrcp.f32 %v794_v44  ;;  %v795_v48 = vadd.f32 1.0, %v1589_v45 }
 0x13b   : > { %v1593_v49 = vpop.eup %1592  ;;  %1602 = vrcp.f32 %v793_v46  ;;  %v796_v50 = vadd.f32 1.0, %v1591_v47 }
 0x13c   : > { %v1595_v51 = vpop.eup %1594  ;;  %1604 = vrcp.f32 %v795_v48  ;;  %v798_v52 = vadd.f32 1.0, %v1593_v49 }
 0x13d   : > { %v1597_v53 = vpop.eup %1596  ;;  %1606 = vrcp.f32 %v796_v50  ;;  %v797_v54 = vadd.f32 1.0, %v1595_v51 }
 0x13e   : > { %1608 = vrcp.f32 %v798_v52  ;;  %v799_v55 = vadd.f32 1.0, %v1597_v53 }
 0x13f   : > { %1610 = vrcp.f32 %v797_v54 }
 0x140   : > { %1612 = vrcp.f32 %v799_v55 }
 0x143   : > { %v1599_v56 = vpop.eup %1598 }
 0x144   : > { %v1601_v57 = vpop.eup %1600  ;;  %v816_v62 = vmul.f32 %v1599_v56, %v717_v18 }
 0x145   : > { %v1603_v58 = vpop.eup %1602  ;;  %v818_v1 = vmul.f32 %v1601_v57, %v760_v19 }
 0x146   : > { %v1605_v59 = vpop.eup %1604  ;;  %v817_v4 = vmul.f32 %v1603_v58, %v719_v22 }
 0x147   : > { %v1607_v60 = vpop.eup %1606  ;;  %v819_v7 = vmul.f32 %v1605_v59, %v1843_v23 }
 0x148   : > { %v1609_v61 = vpop.eup %1608  ;;  %v820_v63 = vmul.f32 %v1607_v60, %v721_v28 }
 0x149   : > { %v1611_v0 = vpop.eup %1610  ;;  %v822_v2 = vmul.f32 %v1609_v61, %v764_v29  ;;  %v893_v29 = vld [vmem:[%s1762_s26] sm:$0xff] }
 0x14a   : > { %v1613_v3 = vpop.eup %1612  ;;  %v824_v5 = vpack.c.bf16 %v820_v63, %v816_v62  ;;  %v821_v6 = vmul.f32 %v1611_v0, %v723_v34 }
 0x14b   : > { %v826_v8 = vpack.c.bf16 %v822_v2, %v818_v1  ;;  %v823_v9 = vmul.f32 %v1613_v3, %v766_v35 }
 0x14c   : > { %v825_v10 = vpack.c.bf16 %v821_v6, %v817_v4 }
 0x14d   : > { %v827_v11 = vpack.c.bf16 %v823_v9, %v819_v7 }
 0x14e   : > { %1130 = vmatprep.mubr.bf16.mxu0 %v825_v10 }
 0x14f   : > { %1171 = vmatprep.mubr.bf16.mxu1 %v827_v11  ;;  %1131 = vmatmul.mubr.bf16.vlgmr.msra.gmra.mrb[4].mxu0 %v824_v5 }
 0x150   : > { %1172 = vmatmul.mubr.bf16.vlgmr.msra.gmra.mrb[4].mxu1 %v826_v8 }
 0x222   : > { %v1444_v12 = vpop.f32.mrb[4].mxu0 }
 0x223   : > { %v1466_v14 = vpop.f32.mrb[4].mxu1  ;;  %v1445_v16 = vpop.f32.mrb[5].mxu0 }
 0x224   : > { %v1446_v17 = vadd.f32 %v1445_v16, %v1444_v12  ;;  %v1467_v18 = vpop.f32.mrb[5].mxu1  ;;  %v1447_v19 = vpop.f32.mrb[6].mxu0 }
 0x225   : > { %v1468_v20 = vadd.f32 %v1467_v18, %v1466_v14  ;;  %v1469_v21 = vpop.f32.mrb[6].mxu1  ;;  %v1448_v22 = vpop.f32.mrb[7].mxu0 }
 0x226   : > { %v1133_v23 = vadd.f32 %v1446_v17, %v1391_v15  ;;  %v1449_v24 = vadd.f32 %v1448_v22, %v1447_v19  ;;  %v1470_v25 = vpop.f32.mrb[7].mxu1 }
 0x227   : > { %v1471_v26 = vadd.f32 %v1470_v25, %v1469_v21 }
 0x228   : > { %v1174_v27 = vadd.f32 %v1468_v20, %v1133_v23  ;;  %v1136_v28 = vadd.f32 %v1449_v24, %v1391_v15 }
 0x22a   : > { %v1190_v30 = vmul.f32 %v1183_v13, %v1174_v27  ;;  %v1177_v31 = vadd.f32 %v1471_v26, %v1136_v28 }
 0x22c   : > { %v1192_v34 = vadd.f32 %v1190_v30, %v893_v29  ;;  %v1191_v35 = vmul.f32 %v1188_v33, %v1177_v31 }
 0x22e   : > { %1194 = vst [vmem:[%s1762_s26] sm:$0xff] %v1192_v34  ;;  %v1193_v36 = vadd.f32 %v1191_v35, %v894_v32 }
 0x230   : > { %1195 = vst [vmem:[%s1762_s26 + $0x8] sm:$0xff] %v1193_v36 }
 0x231 PF: > { %s28_s15 = sadd.s32 1, %s1662_s15   ;;  %s1874_s1 = smov %s1658_s14 }
 0x232   : > { %p25_p6 = scmp.ge.s32.totalorder %s28_s15, 16   ;;  %s1875_s14 = smov %s1877_s16 }
 0x234   :  { %27 = sbr.rel (!%p25_p6) target bundleno = 27 (0x1b), region = 97 }

</bundles_post_ra>
